<compile_context>
chip_gen: v5e
topology: v5e:2x2
jax: 0.10.0
libtpu: 0.0.40
codegen_flags: <defaults>
</compile_context>

<pallas_src>
import math

import jax
import jax.numpy as jnp
from jax import lax
from jax.experimental import pallas as pl
from jax.experimental.pallas import tpu as pltpu


# ------------------------------- small helpers --------------------------------

def _pick_block(dim, candidates):
    """Largest candidate that evenly divides `dim`, else the full dim."""
    for c in candidates:
        if dim >= c and dim % c == 0:
            return c
    return dim


def _device_kind():
    try:
        return jax.devices()[0].device_kind.lower()
    except Exception:  # pragma: no cover
        return ""


def _vmem_limit_bytes():
    """Raise scoped VMEM with headroom; leave default on unrecognized chips."""
    kind = _device_kind()
    if "v7" in kind or "tpu7" in kind:
        return 48 * 1024 * 1024     # 64 MiB physical on v7x -> leave headroom
    if "v5" in kind or "v6" in kind:
        return 96 * 1024 * 1024     # 128 MiB physical
    return None


def _use_bf16_exp():
    """bf16 EUP path only on v6e / v7x (v5e has no bf16 EUP -> keep f32)."""
    kind = _device_kind()
    return ("v6" in kind) or ("v7" in kind) or ("tpu7" in kind)


# ------------------------- per-head input projections -------------------------
# y_h = x @ W_h + b_h, written directly into (H, R, Dh) head-major layout.

def _proj_heads_kernel(x_ref, w_ref, b_ref, o_ref):
    # x (TR, Din) bf16, w (1, Din, Dh) bf16, b (1, 1, Dh) f32, o (1, TR, Dh)
    y = jnp.dot(x_ref[...], w_ref[0], preferred_element_type=jnp.float32)
    o_ref[0] = (y + b_ref[0]).astype(o_ref.dtype)


def _proj_heads(x, w_h, b_h, *, out_dtype):
    """x: (R, Din) bf16, w_h: (H, Din, Dh) bf16, b_h: (H, 1, Dh) f32 -> (H, R, Dh)."""
    R, Din = x.shape
    H, _, Dh = w_h.shape
    TR = _pick_block(R, (512, 256, 128))
    # TODO(synk): tile the contraction (Din) axis with an f32 accumulator for
    #             very large embed dims; not needed at these sizes.
    nbytes = R * Din * 2 + H * Din * Dh * 2 + H * Dh * 4 + H * R * Dh * 2
    return pl.pallas_call(
        _proj_heads_kernel,
        out_shape=jax.ShapeDtypeStruct((H, R, Dh), out_dtype),
        grid=(R // TR, H),                      # head axis innermost -> x tile reused
        in_specs=[
            pl.BlockSpec((TR, Din), lambda r, h: (r, 0)),
            pl.BlockSpec((1, Din, Dh), lambda r, h: (h, 0, 0)),
            pl.BlockSpec((1, 1, Dh), lambda r, h: (h, 0, 0)),
        ],
        out_specs=pl.BlockSpec((1, TR, Dh), lambda r, h: (h, r, 0)),
        compiler_params=pltpu.CompilerParams(
            dimension_semantics=("parallel", "arbitrary"),
            vmem_limit_bytes=_vmem_limit_bytes()),
        cost_estimate=pl.CostEstimate(
            flops=2 * R * Din * H * Dh, transcendentals=0, bytes_accessed=nbytes),
    )(x, w_h, b_h)


# ------------------------ output projection (head reduce) ---------------------
# out = sum_h attn_h @ Wo_h + bo, consuming head-major input with no transpose.

def _out_proj_kernel(x_ref, w_ref, b_ref, o_ref, acc_ref):
    h = pl.program_id(2)

    @pl.when(h == 0)
    def _init():
        acc_ref[...] = jnp.zeros_like(acc_ref)

    acc_ref[...] += jnp.dot(x_ref[0], w_ref[0], preferred_element_type=jnp.float32)

    @pl.when(h == pl.num_programs(2) - 1)
    def _finalize():
        o_ref[...] = (acc_ref[...] + b_ref[...]).astype(o_ref.dtype)


def _out_proj(x_h, w_h, b, *, out_dtype):
    """x_h: (H, R, Dh) bf16, w_h: (H, Dh, Dout) bf16, b: (Dout,) f32 -> (R, Dout)."""
    H, R, Dh = x_h.shape
    Dout = w_h.shape[2]
    TR = _pick_block(R, (512, 256, 128))
    TN = _pick_block(Dout, (512, 256, 128))
    b2 = b.reshape(1, Dout).astype(jnp.float32)
    nbytes = (Dout // TN) * H * R * Dh * 2 + (R // TR) * H * Dh * Dout * 2 \
        + Dout * 4 + R * Dout * jnp.dtype(out_dtype).itemsize
    return pl.pallas_call(
        _out_proj_kernel,
        out_shape=jax.ShapeDtypeStruct((R, Dout), out_dtype),
        grid=(R // TR, Dout // TN, H),          # head axis = reduction (innermost)
        in_specs=[
            pl.BlockSpec((1, TR, Dh), lambda r, n, h: (h, r, 0)),
            pl.BlockSpec((1, Dh, TN), lambda r, n, h: (h, 0, n)),
            pl.BlockSpec((1, TN), lambda r, n, h: (0, n)),
        ],
        out_specs=pl.BlockSpec((TR, TN), lambda r, n, h: (r, n)),
        scratch_shapes=[pltpu.VMEM((TR, TN), jnp.float32)],
        compiler_params=pltpu.CompilerParams(
            dimension_semantics=("parallel", "parallel", "arbitrary"),
            vmem_limit_bytes=_vmem_limit_bytes()),
        cost_estimate=pl.CostEstimate(
            flops=2 * R * H * Dh * Dout, transcendentals=0, bytes_accessed=nbytes),
    )(x_h, w_h, b2)


# --------------------------- flash attention kernel ---------------------------

def _make_flash_kernel(*, scale, use_bf16_exp, has_mask):
    def kernel(*args):
        if has_mask:
            (flags_ref, mask_ref, q_ref, k_ref, v_ref,
             o_ref, m_sc, l_sc, acc_sc) = args
        else:
            q_ref, k_ref, v_ref, o_ref, m_sc, l_sc, acc_sc = args
            flags_ref = mask_ref = None

        si = pl.program_id(3)

        @pl.when(si == 0)
        def _init():
            m_sc[...] = jnp.full_like(m_sc, -jnp.inf)
            l_sc[...] = jnp.zeros_like(l_sc)
            acc_sc[...] = jnp.zeros_like(acc_sc)

        def _block():
            # scale folded into the (TL, Dh) q tile instead of the (TL, TS) plane
            q = q_ref[0, 0] * scale      # (TL, Dh) bf16
            k = k_ref[0, 0]              # (TS, Dh) bf16
            v = v_ref[0, 0]              # (TS, Dh) bf16

            # scores = q @ k^T, contracting Dh of both operands (no transpose).
            s = lax.dot_general(q, k, (((1,), (1,)), ((), ())),
                                preferred_element_type=jnp.float32)  # (TL, TS) f32
            if has_mask:
                # bf16 0/1 mask streamed from HBM; -1e9 fill matches torch masked_fill.
                s = jnp.where(mask_ref[...] == 0, -1e9, s)

            m_prev = m_sc[...]                                       # (TL, 1)
            m_new = jnp.maximum(m_prev, jnp.max(s, axis=-1, keepdims=True))
            alpha = jnp.exp(m_prev - m_new)
            x = s - m_new
            # bf16 exp on bf16-capable EUPs (v6e/v7x); f32 elsewhere (v5e).
            p = jnp.exp(x.astype(jnp.bfloat16)) if use_bf16_exp else jnp.exp(x)

            l_sc[...] = alpha * l_sc[...] + jnp.sum(
                p, axis=-1, keepdims=True, dtype=jnp.float32)
            acc_sc[...] = alpha * acc_sc[...] + jnp.dot(
                p.astype(v.dtype), v, preferred_element_type=jnp.float32)
            m_sc[...] = m_new

        if has_mask:
            # Skip fully-masked blocks.  The block map is built so that blocks
            # belonging to a row-block containing a fully-masked row are never
            # skipped, preserving the reference's degenerate-row semantics.
            @pl.when(flags_ref[pl.program_id(2), si] != 0)
            def _():
                _block()
        else:
            _block()

        @pl.when(si == pl.num_programs(3) - 1)
        def _finalize():
            # approx reciprocal is within bf16-level output tolerance.
            inv_l = pl.reciprocal(l_sc[...], approx=True)
            o_ref[0, 0] = (acc_sc[...] * inv_l).astype(o_ref.dtype)

    return kernel


def _flash_attention(q, k, v, mask, *, scale):
    """q: (H, B, L, Dh), k/v: (H, B, S, Dh) bf16, mask: (L, S) or None -> (H, B, L, Dh)."""
    H, B, L, Dh = q.shape
    S = k.shape[2]
    TL = _pick_block(L, (512, 256, 128))
    TS = _pick_block(S, (1024, 512, 256, 128))
    nL, nS = L // TL, S // TS
    has_mask = mask is not None

    kernel = _make_flash_kernel(scale=scale, use_bf16_exp=_use_bf16_exp(),
                                has_mask=has_mask)

    q_spec = pl.BlockSpec((1, 1, TL, Dh), lambda b, h, li, si, *_: (h, b, li, 0))
    k_spec = pl.BlockSpec((1, 1, TS, Dh), lambda b, h, li, si, *_: (h, b, si, 0))
    v_spec = pl.BlockSpec((1, 1, TS, Dh), lambda b, h, li, si, *_: (h, b, si, 0))
    o_spec = pl.BlockSpec((1, 1, TL, Dh), lambda b, h, li, si, *_: (h, b, li, 0))

    in_specs = [q_spec, k_spec, v_spec]
    num_prefetch = 0
    if has_mask:
        mask01 = (mask != 0)
        mask_bf16 = mask01.astype(jnp.bfloat16)
        # Block skip map (scalar-prefetched into SMEM):
        #   keep a block if it has any unmasked entry, OR if its row-block
        #   contains a fully-masked row (degenerate case must be computed to
        #   match the reference's uniform-softmax behaviour exactly).
        blk = mask01.reshape(nL, TL, nS, TS)
        block_any = jnp.any(blk, axis=(1, 3))                              # (nL, nS)
        row_all_masked = jnp.logical_not(jnp.any(mask01, axis=1))          # (L,)
        degenerate = jnp.any(row_all_masked.reshape(nL, TL), axis=1)       # (nL,)
        flags = jnp.logical_or(block_any, degenerate[:, None]).astype(jnp.int32)

        mask_spec = pl.BlockSpec((TL, TS), lambda b, h, li, si, *_: (li, si))
        in_specs = [mask_spec] + in_specs
        num_prefetch = 1
        operands = (flags, mask_bf16, q, k, v)
        mask_bytes = B * H * L * S * 2
    else:
        operands = (q, k, v)
        mask_bytes = 0

    flops = 4 * B * H * L * S * Dh
    trans = B * H * L * S
    nbytes = (B * H * L * Dh * 2 + 2 * nL * B * H * S * Dh + B * H * L * Dh) * 2 \
        + mask_bytes

    grid_spec = pltpu.PrefetchScalarGridSpec(
        num_scalar_prefetch=num_prefetch,
        grid=(B, H, nL, nS),
        in_specs=in_specs,
        out_specs=o_spec,
        scratch_shapes=[
            pltpu.VMEM((TL, 1), jnp.float32),    # running max m
            pltpu.VMEM((TL, 1), jnp.float32),    # running denom l
            pltpu.VMEM((TL, Dh), jnp.float32),   # output accumulator
        ])

    return pl.pallas_call(
        kernel,
        out_shape=jax.ShapeDtypeStruct((H, B, L, Dh), q.dtype),
        grid_spec=grid_spec,
        compiler_params=pltpu.CompilerParams(
            dimension_semantics=("parallel", "parallel", "parallel", "arbitrary"),
            vmem_limit_bytes=_vmem_limit_bytes()),
        cost_estimate=pl.CostEstimate(
            flops=flops, transcendentals=trans, bytes_accessed=nbytes),
    )(*operands)


# --------------------------------- wrapper ------------------------------------

def multi_head_attention(q, k, v, mask, params, *, num_heads,
                         compute_dtype=jnp.bfloat16):
    """q: (B, L, Dq), k: (B, S, Dk), v: (B, S, Dv), mask: (L, S) (0 == masked) or None."""
    wq, wk, bk, wv, bv, wo, bo = params       # PyTorch-layout weights: (out, in)
    B, L, Dq = q.shape
    _, S, Dk = k.shape
    _, _, Dv = v.shape
    E = wq.shape[0]
    out_dim = wo.shape[0]
    H = num_heads
    Dh = E // H

    # One-time weight re-layouts (small; activations never get transposed).
    def head_major(w):  # (E, Din) -> (H, Din, Dh)
        return jnp.transpose(w.reshape(H, Dh, -1), (0, 2, 1)).astype(compute_dtype)

    wq_h = head_major(wq)
    wk_h = head_major(wk)
    wv_h = head_major(wv)
    wo_h = wo.T.reshape(H, Dh, out_dim).astype(compute_dtype)   # (H, Dh, out_dim)
    bq_h = jnp.zeros((H, 1, Dh), jnp.float32)                   # proj_q has bias=False
    bk_h = bk.reshape(H, 1, Dh).astype(jnp.float32)
    bv_h = bv.reshape(H, 1, Dh).astype(jnp.float32)

    # Per-head projections, written directly in head-major layout (no transposes).
    qh = _proj_heads(q.reshape(B * L, Dq).astype(compute_dtype), wq_h, bq_h,
                     out_dtype=compute_dtype).reshape(H, B, L, Dh)
    kh = _proj_heads(k.reshape(B * S, Dk).astype(compute_dtype), wk_h, bk_h,
                     out_dtype=compute_dtype).reshape(H, B, S, Dh)
    vh = _proj_heads(v.reshape(B * S, Dv).astype(compute_dtype), wv_h, bv_h,
                     out_dtype=compute_dtype).reshape(H, B, S, Dh)

    attn = _flash_attention(qh, kh, vh, mask, scale=1.0 / math.sqrt(Dh))  # (H,B,L,Dh)

    out = _out_proj(attn.reshape(H, B * L, Dh), wo_h, bo, out_dtype=jnp.float32)
    return out.reshape(B, L, out_dim)


# -------------------------------- reference -----------------------------------

def _reference(q, k, v, mask, params, *, num_heads):
    """Pure-JAX f32 reference mirroring the PyTorch module (dropout p=0)."""
    wq, wk, bk, wv, bv, wo, bo = params
    B, L, _ = q.shape
    E = wq.shape[0]
    Dh = E // num_heads
    qp = q @ wq.T
    kp = k @ wk.T + bk
    vp = v @ wv.T + bv

    def split(x):
        return x.reshape(B, -1, num_heads, Dh).transpose(0, 2, 1, 3)

    qh, kh, vh = split(qp), split(kp), split(vp)
    w = jnp.einsum('bhld,bhsd->bhls', qh, kh) / math.sqrt(Dh)
    if mask is not None:
        w = jnp.where(mask[None, None] == 0, -1e9, w)
    w = jax.nn.softmax(w, axis=-1)
    out = jnp.einsum('bhls,bhsd->bhld', w, vh)
    out = out.transpose(0, 2, 1, 3).reshape(B, L, E)
    return out @ wo.T + bo


if __name__ == "__main__":
    # Module config (defaults: q_dim=k_dim=v_dim=out_dim=embed_dim, dropout=0)
    embed_dim = 32
    num_heads = 4
    B, L, S = 2, 8, 8

    key = jax.random.PRNGKey(0)
    ks = jax.random.split(key, 10)

    def linear_init(kw, out_f, in_f):
        bound = 1.0 / math.sqrt(in_f)
        return jax.random.uniform(kw, (out_f, in_f), jnp.float32, -bound, bound)

    wq = linear_init(ks[0], embed_dim, embed_dim)                       # proj_q, bias=False
    wk = linear_init(ks[1], embed_dim, embed_dim)                       # proj_k, kv_bias=False
    bk = jnp.zeros((embed_dim,), jnp.float32)
    wv = linear_init(ks[2], embed_dim, embed_dim)                       # proj_v
    bv = jnp.zeros((embed_dim,), jnp.float32)
    wo = linear_init(ks[3], embed_dim, embed_dim)                       # out_proj, bias=True
    bo = jax.random.uniform(ks[4], (embed_dim,), jnp.float32,
                            -1.0 / math.sqrt(embed_dim), 1.0 / math.sqrt(embed_dim))
    params = (wq, wk, bk, wv, bv, wo, bo)

    q = jax.random.normal(ks[5], (B, L, embed_dim), jnp.float32)
    k = jax.random.normal(ks[6], (B, S, embed_dim), jnp.float32)
    v = jax.random.normal(ks[7], (B, S, embed_dim), jnp.float32)
    # causal-style mask (0 == masked) to exercise the masking + block-skip path
    mask = jnp.tril(jnp.ones((L, S), jnp.float32))

    out = multi_head_attention(q, k, v, mask, params, num_heads=num_heads)
    out = jax.block_until_ready(out)

    ref = _reference(q, k, v, mask, params, num_heads=num_heads)
    assert out.shape == (B, L, embed_dim)
    # bf16 MXU operands (f32 accumulation / softmax) -> bf16-level tolerance.
    assert jnp.allclose(out, ref, atol=5e-2, rtol=5e-2), "mismatch vs reference"

    print("KERNEL_OK")
</pallas_src>

<mosaic_0001>
module attributes {stable_mosaic.version = 11 : i64} {
  func.func @_proj_heads_kernel(%arg0: i32, %arg1: i32, %arg2: memref<16x32xbf16, #tpu.memory_space<vmem>>, %arg3: memref<1x32x8xbf16, #tpu.memory_space<vmem>>, %arg4: memref<1x1x8xf32, #tpu.memory_space<vmem>>, %arg5: memref<1x16x8xbf16, #tpu.memory_space<vmem>>) attributes {dimension_semantics = [#tpu.dimension_semantics<parallel>, #tpu.dimension_semantics<arbitrary>], iteration_bounds = array<i64: 1, 4>, scalar_prefetch = 0 : i64, scratch_operands = 0 : i64, tpu.core_type = #tpu.core_type<tc>, window_params = [{transform_indices = @transform_0, window_bounds = array<i64: 16, 32>}, {transform_indices = @transform_1, window_bounds = array<i64: 1, 32, 8>}, {transform_indices = @transform_2, window_bounds = array<i64: 1, 1, 8>}, {transform_indices = @transform_3, window_bounds = array<i64: 1, 16, 8>}]} {
    %c0 = arith.constant 0 : index
    %c0_0 = arith.constant 0 : index
    %0 = vector.load %arg2[%c0, %c0_0] : memref<16x32xbf16, #tpu.memory_space<vmem>>, vector<16x32xbf16>
    %c0_1 = arith.constant 0 : index
    %c0_2 = arith.constant 0 : index
    %c0_3 = arith.constant 0 : index
    %1 = vector.load %arg3[%c0_1, %c0_2, %c0_3] : memref<1x32x8xbf16, #tpu.memory_space<vmem>>, vector<1x32x8xbf16>
    %2 = vector.shape_cast %1 : vector<1x32x8xbf16> to vector<32x8xbf16>
    %cst = arith.constant dense<0.000000e+00> : vector<16x8xf32>
    %3 = tpu.matmul %0, %2, %cst {dimension_numbers = #tpu.dot_dimension_numbers<[1], [0], [0], [1], [0, 0, 1, 1], [], []>} : vector<16x32xbf16>, vector<32x8xbf16>, vector<16x8xf32> -> vector<16x8xf32>
    %c0_4 = arith.constant 0 : index
    %c0_5 = arith.constant 0 : index
    %c0_6 = arith.constant 0 : index
    %4 = vector.load %arg4[%c0_4, %c0_5, %c0_6] : memref<1x1x8xf32, #tpu.memory_space<vmem>>, vector<1x1x8xf32>
    %5 = vector.shape_cast %4 : vector<1x1x8xf32> to vector<1x8xf32>
    %6 = vector.broadcast %5 : vector<1x8xf32> to vector<16x8xf32>
    %7 = arith.addf %3, %6 : vector<16x8xf32>
    %8 = arith.truncf %7 : vector<16x8xf32> to vector<16x8xbf16>
    %c0_7 = arith.constant 0 : index
    %c0_8 = arith.constant 0 : index
    %c0_9 = arith.constant 0 : index
    %9 = vector.load %arg5[%c0_7, %c0_8, %c0_9] : memref<1x16x8xbf16, #tpu.memory_space<vmem>>, vector<1x16x8xbf16>
    %10 = vector.shape_cast %9 : vector<1x16x8xbf16> to vector<16x8xbf16>
    %11 = vector.shape_cast %8 : vector<16x8xbf16> to vector<1x16x8xbf16>
    tpu.vector_store %arg5[%c0_7, %c0_8, %c0_9], %11 {strides = array<i32>} : memref<1x16x8xbf16, #tpu.memory_space<vmem>>, vector<1x16x8xbf16>,
    return
  }
  func.func @transform_0(%arg0: i32, %arg1: i32) -> (i32, i32) {
    %c0_i32 = arith.constant 0 : i32
    %c0_i32_0 = arith.constant 0 : i32
    return %arg0, %c0_i32 : i32, i32
  }
  func.func @transform_1(%arg0: i32, %arg1: i32) -> (i32, i32, i32) {
    %c0_i32 = arith.constant 0 : i32
    %c0_i32_0 = arith.constant 0 : i32
    %c0_i32_1 = arith.constant 0 : i32
    return %arg1, %c0_i32, %c0_i32_0 : i32, i32, i32
  }
  func.func @transform_2(%arg0: i32, %arg1: i32) -> (i32, i32, i32) {
    %c0_i32 = arith.constant 0 : i32
    %c0_i32_0 = arith.constant 0 : i32
    %c0_i32_1 = arith.constant 0 : i32
    return %arg1, %c0_i32, %c0_i32_0 : i32, i32, i32
  }
  func.func @transform_3(%arg0: i32, %arg1: i32) -> (i32, i32, i32) {
    %c0_i32 = arith.constant 0 : i32
    %c0_i32_0 = arith.constant 0 : i32
    return %arg1, %arg0, %c0_i32 : i32, i32, i32
  }
}

</mosaic_0001>

<bundles_post_ra>
// kernel: tpu_custom_call.1
= control target key start
LH: loop header
LB: loop body
LE: loop exit
PB: predicated region body
PF: predicated region fallthrough
CT: control target
= control target key end

     0   :  { %s485_s12 = smov 0   ;;  %s487_s13 = smov 0   ;;  %s524_s0 = inlined_call_operand.vmem [shape: bf16[16,32], index: 0, kind: input, shape index: {}]   ;;  %s525_s1 = inlined_call_operand.vmem [shape: bf16[4,32,8], index: 1, kind: input, shape index: {}]   ;;  %s526_s2 = inlined_call_operand.vmem [shape: f32[4,1,8], index: 2, kind: input, shape index: {}]   ;;  %s527_s3 = inlined_call_operand.vmem [shape: bf16[4,16,8], index: 3, kind: output, shape index: {}]  }
   0x1   :  { %s489_s14 = smov 0  }
   0x2 LB: > { %s22_s15 = sadd.s32 1, %s459_s13  ;;  %p391_p0 = scmp.ge.s32.totalorder %s463_s14, 1  ;;  %s463_s14 = sphi %s489_s14, %s13_s14   ;;  %s459_s13 = sphi %s487_s13, %s529_s13   ;;  %s455_s12 = sphi %s485_s12, %s528_s12  }
   0x3   : > { %p23_p1 = scmp.ge.s32.totalorder %s22_s15, 4  ;;  %p170_p2 = scmp.lt.s32.totalorder %s463_s14, 5 }
   0x5   : > { %s531_s15 = smov (%p23_p1, %s22_s15), 0  ;;  %p171_p3 = pnand %p391_p0, %p170_p2 }
   0x6   : > { %p212_p4 = scmp.lt.s32.totalorder (!%p171_p3), %s455_s12, 3 }
   0x7   : > { %174 = sbr.rel (%p171_p3) target bundleno = 162 (0xa2), region = 32 }
   0xc   : > { %s533_s12 = smov (!%p212_p4, %s455_s12), 3  ;;  %v413_v2 = vld [vmem:[%s524_s0] sm:$0xff]  ;;  %vm258_vm0 = vcmask 261120   ;;  %vm278_vm1 = vcmask 60416  }
   0xd   : > { %s411_s16 = sshll.u32 %s533_s12, 4  ;;  %s219_s19 = scalar_lea.vmem %s526_s2, %s533_s12 }
   0xe   : > { %s216_s22 = scalar_lea.vmem %s525_s1, %s411_s16  ;;  %v440_v3 = vld [vmem:[%s219_s19] ss:$0 sm:$0xff]  ;;  %s412_s25 = sshll.u32 %s533_s12, 3 }
   0xf   : > { %v415_v0 = vld [vmem:[%s216_s22 + $0x8] sm:$0xff]  ;;  %v414_v1 = vld [vmem:[%s216_s22] sm:$0xff]  ;;  %s228_s28 = scalar_lea.vmem %s527_s3, %s412_s25 }
  0x10   : > { %268 = vmatpush.bf16.msra.mxu0 %v415_v0 }
  0x14   : > { %269 = vmatpush.bf16.msra.mxu0 %v414_v1 }
  0x17   : > { %408 = vmatmul.msk.bf16.vlgmr.msra.gmra.mxu0 %vm258_vm0, %v413_v2 }
  0x94   : > { %v271_v4 = vpop.f32.mrf.mxu0 }
  0x95   : > { %v272_v5 = vadd.f32 %v440_v3, %v271_v4 }
  0x97   : > { %v276_v6 = vpack.c.bf16 %v272_v5, %v272_v5 }
  0x99   : > { %279 = vst.msk [vmem:[%s228_s28] sm:$0xf] %vm278_vm1, %v276_v6 }
  0x9c   : > { %v273_v7 = vpop.f32.mrf.mxu0 }
  0x9d   : > { %v274_v8 = vadd.f32 %v440_v3, %v273_v7 }
  0x9f   : > { %v277_v9 = vpack.c.bf16 %v274_v8, %v274_v8 }
  0xa1   : > { %280 = vst.msk [vmem:[%s228_s28 + $0x4] sm:$0xf] %vm278_vm1, %v277_v9 }
  0xa2 PF: > { %s13_s14 = sadd.s32 1, %s463_s14   ;;  %s528_s12 = smov %s459_s13 }
  0xa3   : > { %p10_p5 = scmp.ge.s32.totalorder %s13_s14, 6   ;;  %s529_s13 = smov %s531_s15 }
  0xa5   :  { %12 = sbr.rel (!%p10_p5) target bundleno = 2 (0x2), region = 68 }

</bundles_post_ra>
